<compile_context>
chip_gen: v7x
topology: tpu7x:2x2x1
jax: 0.10.0
libtpu: 0.0.40
codegen_flags: <defaults>
</compile_context>

<pallas_src>
import math

import numpy as np

import jax
import jax.numpy as jnp
from jax.experimental import pallas as pl
from jax.experimental.pallas import tpu as pltpu

LANE = 128  # TPU vreg lane width; keep trailing dims multiples of this.


def _round_up(n: int, m: int) -> int:
    return ((n + m - 1) // m) * m


# --------------------------------------------------------------------------
# Kernel
# --------------------------------------------------------------------------
def mlp_kernel(x_ref, w1_ref, b1_ref, pool_ref, o_ref, acc_ref):
    """One (row-tile, K-tile) grid step of AdaptiveAvgPool1d(GELU(x @ W1 + b1)).

    x_ref    : (tm, tk)       f32  (cast to bf16 in-VMEM for the MXU)
    w1_ref   : (tk, Hp)       bf16
    b1_ref   : (1, Hp)        f32  (resident, single-buffered)
    pool_ref : (Hp, Doutp)    bf16 (exact AdaptiveAvgPool1d matrix, resident)
    o_ref    : (tm, Doutp)    bf16 (lane-dense, 128-multiple last dim)
    acc_ref  : (tm, Hp)       f32  VMEM accumulator across the K grid axis
    """
    k = pl.program_id(1)

    @pl.when(k == 0)
    def _init():
        acc_ref[...] = jnp.zeros_like(acc_ref)

    # fc1 on the MXU: bf16 operands, f32 accumulation.
    acc_ref[...] += jnp.dot(
        x_ref[...].astype(w1_ref.dtype), w1_ref[...],
        preferred_element_type=jnp.float32)

    @pl.when(k == pl.num_programs(1) - 1)
    def _finalize():
        h = acc_ref[...] + b1_ref[...]
        # Exact (erf) GELU, f32 epilogue (matches torch.nn.GELU()); multiply by
        # 1/sqrt(2) instead of dividing.  (On v6e/v7x a bf16 epilogue would
        # halve VALU slots, but the kernel is not VALU-bound here.)
        h = 0.5 * h * (1.0 + jax.lax.erf(h * 0.7071067811865476))
        # AdaptiveAvgPool1d over the hidden axis as a second MXU matmul with a
        # precomputed, zero-padded (lane-dense) pooling matrix.
        out = jnp.dot(h.astype(pool_ref.dtype), pool_ref[...],
                      preferred_element_type=jnp.float32)
        o_ref[...] = out.astype(o_ref.dtype)


# --------------------------------------------------------------------------
# One-time parameter preparation (hoisted out of the per-call path)
# --------------------------------------------------------------------------
def make_pool_matrix(hidden_features: int, out_features: int) -> np.ndarray:
    """Exact AdaptiveAvgPool1d(out_features) as a (hidden, out) f32 matrix.

    P[h, o] = 1/(end_o - start_o) for start_o <= h < end_o,
    start_o = floor(o*H/O), end_o = ceil((o+1)*H/O)  (PyTorch semantics).
    Pure-integer ceil avoids fp-rounding off-by-one for large H.
    """
    P = np.zeros((hidden_features, out_features), dtype=np.float32)
    for o in range(out_features):
        start = (o * hidden_features) // out_features
        end = -((-(o + 1) * hidden_features) // out_features)  # integer ceil
        P[start:end, o] = 1.0 / (end - start)
    return P


def prepare_mlp_params(w1, b1, out_features, *, param_dtype=jnp.bfloat16):
    """Pad + cast parameters ONCE.

    w1: (in_features, hidden_features)   (transposed PyTorch fc1.weight)
    b1: (hidden_features,)
    Returns (w1p, b1p, poolp) with hidden/out feature dims zero-padded to a
    128-lane multiple and matmul operands cast to bf16.  Padding is exact:
    padded hidden columns get zero weight/bias and zero pool rows.
    """
    Din, H = w1.shape
    Hp = _round_up(H, LANE)
    Doutp = _round_up(out_features, LANE)

    w1p = jnp.zeros((Din, Hp), param_dtype).at[:, :H].set(w1.astype(param_dtype))
    b1p = jnp.zeros((1, Hp), jnp.float32).at[:, :H].set(
        jnp.reshape(b1, (1, H)).astype(jnp.float32))
    pool = make_pool_matrix(H, out_features)
    poolp = jnp.zeros((Hp, Doutp), param_dtype).at[:H, :out_features].set(
        jnp.asarray(pool, dtype=param_dtype))
    return w1p, b1p, poolp


# --------------------------------------------------------------------------
# Tile-size / VMEM-budget helpers
# --------------------------------------------------------------------------
def _pick_tm(M: int, tm: int) -> int:
    """Row tile (sublane multiple).  Keep >= 2 grid steps along the "parallel"
    row axis when M allows, so v7x megacore sharding has work for both TCs."""
    if M >= 16:
        tm = min(tm, _round_up(pl.cdiv(M, 2), 8))
    return max(8, min(tm, _round_up(M, 8)))


def _pick_tk(Din: int, tk_max: int = 512) -> int:
    """K (reduction) tile.  256-multiples feed the 256-wide MXU on v6e/v7x;
    small / irregular Din falls back to a single full-width K step (block dim
    equals the full array dim, so no padding of x is needed)."""
    for cand in (tk_max, 512, 256, 128):
        if cand <= tk_max and Din % cand == 0:
            return cand
    return Din


def _vmem_limit_bytes(tm, tk, Hp, Doutp, x_itemsize, out_itemsize, num_k):
    """Request only the VMEM we actually need (plus headroom), capped at
    48 MiB so the same config is still safe on v7x's 64 MiB physical VMEM."""
    pbytes = 2  # bf16 params
    est = (2 * tm * tk * x_itemsize                    # x tile, double-buffered
           + (2 if num_k > 1 else 1) * tk * Hp * pbytes  # w1 tile
           + Hp * 4                                    # bias, single-buffered
           + Hp * Doutp * pbytes                       # pool, single-buffered
           + 2 * tm * Doutp * out_itemsize             # out tile, double-buffered
           + tm * Hp * 4)                              # f32 accumulator scratch
    default_scoped = 32 * 1024 * 1024
    if est + (8 << 20) <= default_scoped:
        return None  # default scoped-VMEM limit is plenty
    return min(est + (8 << 20), 48 * 1024 * 1024)


# --------------------------------------------------------------------------
# Forward wrapper
# --------------------------------------------------------------------------
def mlp_forward(x, w1p, b1p, poolp, out_features, *, tm=256, tk_max=512,
                out_dtype=jnp.bfloat16):
    """x: (B, N, in_features) -> (B, N, out_features) (in `out_dtype`).

    Takes pre-padded / pre-cast params from prepare_mlp_params().  x itself is
    passed unpadded (reshape only, no copy); the row grid uses cdiv so the
    partial edge tile is masked by Pallas.
    """
    B, N, Din = x.shape
    Din_w, Hp = w1p.shape
    Hp2, Doutp = poolp.shape
    assert Din_w == Din and Hp2 == Hp and b1p.shape == (1, Hp)

    M = B * N
    x2 = x.reshape(M, Din)  # contiguous reshape: no copy, no padding pass

    tm = _pick_tm(M, tm)
    tk = _pick_tk(Din, tk_max)
    assert Din % tk == 0, "K tile must divide Din exactly (see TODO at top)"
    num_m = pl.cdiv(M, tm)
    num_k = Din // tk

    vmem_limit = _vmem_limit_bytes(
        tm, tk, Hp, Doutp,
        x_itemsize=x2.dtype.itemsize,
        out_itemsize=jnp.dtype(out_dtype).itemsize,
        num_k=num_k)

    out2 = pl.pallas_call(
        mlp_kernel,
        out_shape=jax.ShapeDtypeStruct((M, Doutp), out_dtype),
        grid_spec=pltpu.PrefetchScalarGridSpec(
            num_scalar_prefetch=0,
            grid=(num_m, num_k),
            in_specs=[
                # x row/K tile.
                pl.BlockSpec((tm, tk), lambda i, k: (i, k)),
                # w1 K tile: double-buffered when pipelining over K, single
                # buffer when it is effectively resident (num_k == 1).
                pl.BlockSpec((tk, Hp), lambda i, k: (k, 0),
                             pipeline_mode=pl.Buffered(1 if num_k == 1 else 2)),
                # bias / pool matrix: constant block index -> resident,
                # single-buffered (halves their VMEM footprint).
                pl.BlockSpec((1, Hp), lambda i, k: (0, 0),
                             pipeline_mode=pl.Buffered(1)),
                pl.BlockSpec((Hp, Doutp), lambda i, k: (0, 0),
                             pipeline_mode=pl.Buffered(1)),
            ],
            out_specs=pl.BlockSpec((tm, Doutp), lambda i, k: (i, 0)),
            scratch_shapes=[pltpu.VMEM((tm, Hp), jnp.float32)],
        ),
        compiler_params=pltpu.CompilerParams(
            dimension_semantics=("parallel", "arbitrary"),
            vmem_limit_bytes=vmem_limit,
        ),
    )(x2, w1p, b1p, poolp)

    # Padded output columns are exact zeros; slice them away.  Output stays in
    # out_dtype (bf16) -- no wrapper-side re-cast pass.
    return out2[:, :out_features].reshape(B, N, out_features)


# --------------------------------------------------------------------------
# Pure-JAX reference
# --------------------------------------------------------------------------
def mlp_reference(x, w1, b1, pool):
    h = jnp.einsum("bnd,dh->bnh", x, w1) + b1
    h = 0.5 * h * (1.0 + jax.lax.erf(h * 0.7071067811865476))
    return jnp.einsum("bnh,ho->bno", h, pool)


if __name__ == "__main__":
    key = jax.random.PRNGKey(0)
    B, N = 2, 8
    in_features = 32
    hidden_features = 64
    out_features = 32  # out_features or in_features

    kx, kw, kb = jax.random.split(key, 3)
    x = jax.random.normal(kx, (B, N, in_features), dtype=jnp.float32)

    # Deterministic Linear params (PyTorch stores W as (hidden, in); we keep
    # the transposed (in, hidden) layout for the kernel).
    bound = 1.0 / math.sqrt(in_features)
    w1 = jax.random.uniform(kw, (in_features, hidden_features),
                            minval=-bound, maxval=bound, dtype=jnp.float32)
    b1 = jax.random.uniform(kb, (hidden_features,),
                            minval=-bound, maxval=bound, dtype=jnp.float32)

    # One-time parameter preparation (padding + bf16 cast hoisted out of the
    # per-call path).
    w1p, b1p, poolp = prepare_mlp_params(w1, b1, out_features)

    y = mlp_forward(x, w1p, b1p, poolp, out_features)
    y = jax.block_until_ready(y)

    pool_f32 = jnp.asarray(make_pool_matrix(hidden_features, out_features),
                           dtype=jnp.float32)
    y_ref = mlp_reference(x, w1, b1, pool_f32)

    assert y.shape == (B, N, out_features)
    # bf16 MXU inputs / bf16 output store (f32 accumulation) -> tolerance
    # reflects bf16 precision.
    err = float(jnp.max(jnp.abs(y.astype(jnp.float32) - y_ref)))
    assert jnp.allclose(y.astype(jnp.float32), y_ref, atol=3e-2, rtol=3e-2), err

    print("KERNEL_OK")
</pallas_src>

<mosaic_0001>
module attributes {stable_mosaic.version = 11 : i64} {
  func.func @mlp_kernel(%arg0: i32, %arg1: i32, %arg2: memref<8x32xf32, #tpu.memory_space<vmem>>, %arg3: memref<32x128xbf16, #tpu.memory_space<vmem>>, %arg4: memref<1x128xf32, #tpu.memory_space<vmem>>, %arg5: memref<128x128xbf16, #tpu.memory_space<vmem>>, %arg6: memref<8x128xbf16, #tpu.memory_space<vmem>>, %arg7: memref<8x128xf32, #tpu.memory_space<vmem>>) attributes {dimension_semantics = [#tpu.dimension_semantics<parallel>, #tpu.dimension_semantics<arbitrary>], iteration_bounds = array<i64: 2, 1>, scalar_prefetch = 0 : i64, scratch_operands = 1 : i64, tpu.core_type = #tpu.core_type<tc>, window_params = [{transform_indices = @transform_0, window_bounds = array<i64: 8, 32>}, {pipeline_mode = #tpu.pipeline_mode<synchronous>, transform_indices = @transform_1, window_bounds = array<i64: 32, 128>}, {pipeline_mode = #tpu.pipeline_mode<synchronous>, transform_indices = @transform_2, window_bounds = array<i64: 1, 128>}, {pipeline_mode = #tpu.pipeline_mode<synchronous>, transform_indices = @transform_3, window_bounds = array<i64: 128, 128>}, {transform_indices = @transform_4, window_bounds = array<i64: 8, 128>}]} {
    %c0_i32 = arith.constant 0 : i32
    %0 = arith.cmpi eq, %arg1, %c0_i32 : i32
    %1 = arith.extui %0 : i1 to i32
    %c0_i32_0 = arith.constant 0 : i32
    %2 = arith.cmpi ne, %1, %c0_i32_0 : i32
    scf.if %2 {
      %cst_10 = arith.constant 0.000000e+00 : f32
      %13 = vector.broadcast %cst_10 : f32 to vector<8x128xf32>
      %c0_11 = arith.constant 0 : index
      %c0_12 = arith.constant 0 : index
      %14 = vector.load %arg7[%c0_11, %c0_12] : memref<8x128xf32, #tpu.memory_space<vmem>>, vector<8x128xf32>
      tpu.vector_store %arg7[%c0_11, %c0_12], %13 {strides = array<i32>} : memref<8x128xf32, #tpu.memory_space<vmem>>, vector<8x128xf32>,
    } else {
    }
    %c0 = arith.constant 0 : index
    %c0_1 = arith.constant 0 : index
    %3 = vector.load %arg7[%c0, %c0_1] : memref<8x128xf32, #tpu.memory_space<vmem>>, vector<8x128xf32>
    %c0_2 = arith.constant 0 : index
    %c0_3 = arith.constant 0 : index
    %4 = vector.load %arg2[%c0_2, %c0_3] : memref<8x32xf32, #tpu.memory_space<vmem>>, vector<8x32xf32>
    %5 = arith.truncf %4 : vector<8x32xf32> to vector<8x32xbf16>
    %c0_4 = arith.constant 0 : index
    %c0_5 = arith.constant 0 : index
    %6 = vector.load %arg3[%c0_4, %c0_5] : memref<32x128xbf16, #tpu.memory_space<vmem>>, vector<32x128xbf16>
    %cst = arith.constant dense<0.000000e+00> : vector<8x128xf32>
    %7 = tpu.matmul %5, %6, %cst {dimension_numbers = #tpu.dot_dimension_numbers<[1], [0], [0], [1], [0, 0, 1, 1], [], []>} : vector<8x32xbf16>, vector<32x128xbf16>, vector<8x128xf32> -> vector<8x128xf32>
    %8 = arith.addf %3, %7 : vector<8x128xf32>
    %c0_6 = arith.constant 0 : index
    %c0_7 = arith.constant 0 : index
    %9 = vector.load %arg7[%c0_6, %c0_7] : memref<8x128xf32, #tpu.memory_space<vmem>>, vector<8x128xf32>
    tpu.vector_store %arg7[%c0_6, %c0_7], %8 {strides = array<i32>} : memref<8x128xf32, #tpu.memory_space<vmem>>, vector<8x128xf32>,
    %c0_i32_8 = arith.constant 0 : i32
    %10 = arith.cmpi eq, %arg1, %c0_i32_8 : i32
    %11 = arith.extui %10 : i1 to i32
    %c0_i32_9 = arith.constant 0 : i32
    %12 = arith.cmpi ne, %11, %c0_i32_9 : i32
    scf.if %12 {
      %c0_10 = arith.constant 0 : index
      %c0_11 = arith.constant 0 : index
      %13 = vector.load %arg7[%c0_10, %c0_11] : memref<8x128xf32, #tpu.memory_space<vmem>>, vector<8x128xf32>
      %c0_12 = arith.constant 0 : index
      %c0_13 = arith.constant 0 : index
      %14 = vector.load %arg4[%c0_12, %c0_13] : memref<1x128xf32, #tpu.memory_space<vmem>>, vector<1x128xf32>
      %15 = vector.broadcast %14 : vector<1x128xf32> to vector<8x128xf32>
      %16 = arith.addf %13, %15 : vector<8x128xf32>
      %cst_14 = arith.constant 5.000000e-01 : f32
      %17 = vector.broadcast %cst_14 : f32 to vector<8x128xf32>
      %18 = arith.mulf %17, %16 : vector<8x128xf32>
      %cst_15 = arith.constant 0.707106769 : f32
      %19 = vector.broadcast %cst_15 : f32 to vector<8x128xf32>
      %20 = arith.mulf %16, %19 : vector<8x128xf32>
      %21 = math.erf %20 : vector<8x128xf32>
      %cst_16 = arith.constant 1.000000e+00 : f32
      %22 = vector.broadcast %cst_16 : f32 to vector<8x128xf32>
      %23 = arith.addf %22, %21 : vector<8x128xf32>
      %24 = arith.mulf %18, %23 : vector<8x128xf32>
      %25 = arith.truncf %24 : vector<8x128xf32> to vector<8x128xbf16>
      %c0_17 = arith.constant 0 : index
      %c0_18 = arith.constant 0 : index
      %26 = vector.load %arg5[%c0_17, %c0_18] : memref<128x128xbf16, #tpu.memory_space<vmem>>, vector<128x128xbf16>
      %cst_19 = arith.constant dense<0.000000e+00> : vector<8x128xf32>
      %27 = tpu.matmul %25, %26, %cst_19 {dimension_numbers = #tpu.dot_dimension_numbers<[1], [0], [0], [1], [0, 0, 1, 1], [], []>} : vector<8x128xbf16>, vector<128x128xbf16>, vector<8x128xf32> -> vector<8x128xf32>
      %28 = arith.truncf %27 : vector<8x128xf32> to vector<8x128xbf16>
      %c0_20 = arith.constant 0 : index
      %c0_21 = arith.constant 0 : index
      %29 = vector.load %arg6[%c0_20, %c0_21] : memref<8x128xbf16, #tpu.memory_space<vmem>>, vector<8x128xbf16>
      tpu.vector_store %arg6[%c0_20, %c0_21], %28 {strides = array<i32>} : memref<8x128xbf16, #tpu.memory_space<vmem>>, vector<8x128xbf16>,
    } else {
    }
    return
  }
  func.func @transform_0(%arg0: i32, %arg1: i32) -> (i32, i32) {
    %c0_i32 = arith.constant 0 : i32
    return %arg0, %arg1 : i32, i32
  }
  func.func @transform_1(%arg0: i32, %arg1: i32) -> (i32, i32) {
    %c0_i32 = arith.constant 0 : i32
    %c0_i32_0 = arith.constant 0 : i32
    return %arg1, %c0_i32 : i32, i32
  }
  func.func @transform_2(%arg0: i32, %arg1: i32) -> (i32, i32) {
    %c0_i32 = arith.constant 0 : i32
    %c0_i32_0 = arith.constant 0 : i32
    %c0_i32_1 = arith.constant 0 : i32
    return %c0_i32, %c0_i32_0 : i32, i32
  }
  func.func @transform_3(%arg0: i32, %arg1: i32) -> (i32, i32) {
    %c0_i32 = arith.constant 0 : i32
    %c0_i32_0 = arith.constant 0 : i32
    %c0_i32_1 = arith.constant 0 : i32
    return %c0_i32, %c0_i32_0 : i32, i32
  }
  func.func @transform_4(%arg0: i32, %arg1: i32) -> (i32, i32) {
    %c0_i32 = arith.constant 0 : i32
    %c0_i32_0 = arith.constant 0 : i32
    return %arg0, %c0_i32 : i32, i32
  }
}

</mosaic_0001>

<bundles_post_ra>
// kernel: tpu_custom_call.1
= control target key start
LH: loop header
LB: loop body
LE: loop exit
PB: predicated region body
PF: predicated region fallthrough
CT: control target
= control target key end

     0   :  { %9 = vsyncpa [#allocation4], 0  ;;  %s1204_s0 = inlined_call_operand.hbm [shape: f32[16,32], index: 0, kind: input, shape index: {}]   ;;  %s1205_s1 = inlined_call_operand.hbm [shape: bf16[32,128], index: 1, kind: input, shape index: {}]   ;;  %s1206_s2 = inlined_call_operand.vmem [shape: f32[1,128], index: 2, kind: input, shape index: {}]   ;;  %s1207_s3 = inlined_call_operand.hbm [shape: bf16[128,128], index: 3, kind: input, shape index: {}]   ;;  %s1208_s4 = inlined_call_operand.hbm [shape: bf16[16,128], index: 4, kind: output, shape index: {}]  }
   0x1   :  { %11 = vsyncpa [#allocation4 + $0x1], 0 }
   0x2   :  { %12 = vsyncpa [#allocation7], 0 }
   0x3   :  { %13 = vsyncpa [#allocation5], 0 }
   0x4   :  { %15 = vsyncpa [#allocation5 + $0x1], 0  ;;  %s950_s15 = smov 0   ;;  %s952_s16 = smov 0  }
   0x5   :  { %s954_s17 = smov 0   ;;  %s956_s18 = smov 0  }
   0x6   :  { %s958_s19 = smov 0   ;;  %s960_s20 = smov 0  }
   0x7 LB: > { %s575_s21 = sadd.s32 4294967295, %s915_s20   ;;  %s576_s22 = sadd.s32 4294967294, %s915_s20   ;;  %s915_s20 = sphi %s960_s20, %s21_s20   ;;  %s911_s19 = sphi %s958_s19, %s1230_s19   ;;  %s907_s18 = sphi %s956_s18, %s1229_s18   ;;  %s903_s17 = sphi %s954_s17, %s1228_s17   ;;  %s899_s16 = sphi %s952_s16, %s1227_s16   ;;  %s895_s15 = sphi %s950_s15, %s1226_s15  }
   0x8   : > { %p55_p0 = scmp.ne.s32.totalorder %s899_s16, %s895_s15  ;;  %p984_p1 = scmp.eq.s32.totalorder %s575_s21, 0 }
   0x9   : > { %p988_p2 = scmp.eq.s32.totalorder %s575_s21, 1  ;;  %p153_p3 = scmp.eq.s32.totalorder %s576_s22, 1 }
   0xa   : > { %s1213_s23 = scalar_select %p984_p1, 1, 0 }
   0xb   : > { %p994_p4 = por %p984_p1, %p55_p0  ;;  %p577_p5 = scmp.ge.s32.totalorder %s915_s20, 1 }
   0xc   : > { %p999_p6 = por %p153_p3, %p55_p0  ;;  %p160_p7 = scmp.lt.s32.totalorder %s915_s20, 3 }
   0xd   : > { %s1215_s25 = scalar_select %p994_p4, 1, 0 }
   0xe   : > { %s1216_s26 = scalar_select %p999_p6, 1, 0 }
   0xf   : > { %p1004_p8 = pnand %p577_p5, %p160_p7  ;;  %s917_s28 = smov [#allocation6]  }
  0x10   : > { %s175_s29 = sshll.u32 %s917_s28, 4  ;;  %s918_s5 = smov [#allocation8]   ;;  %s1008_s29 = int_to_ptr.vmem [resolvable:$true] %s175_s29 }
  0x11   : > { %p656_p9 = pneg %p1004_p8  ;;  %s191_s6 = sshll.u32 %s918_s5, 4  ;;  %s1019_s6 = int_to_ptr.vmem [resolvable:$true] %s191_s6 }
  0x12   : > { %s743_s9 = scalar_lea.hbm %s1205_s1, 256 }
  0x13   : > { %p1015_p11 = pnand %p656_p9, %p984_p1  ;;  %p744_p12 = scmp.ne.s32.totalorder %s1205_s1, %s743_s9 }
  0x14   : > { %p750_p5 = scmp.lt.u32.totalorder %s743_s9, %s1205_s1 }
  0x15   : > { %p745_p13 = pneg %p1015_p11 }
  0x17   : > { %p746_p0 = pnand %p745_p13, %p744_p12 }
  0x19   : > { %p747_p3 = pneg %p746_p0 }
  0x1b   : > { %p752_p7 = pnand %p750_p5, %p747_p3 }
  0x1d   : > { %755 = shalt.err (!%p752_p7)
}
  0x1e   : > { %s756_s14 = scalar_lea.vmem %s1008_s29, 256  ;;  %p764_p1 = scmp.lt.s32.totalorder %s1008_s29, %s1008_s29 }
  0x1f   : > { %p757_p9 = scmp.ne.s32.totalorder %s1008_s29, %s756_s14  ;;  %p765_p12 = scmp.lt.s32.totalorder %s756_s14, %s756_s14 }
  0x21   : > { %p759_p10 = pnand %p757_p9, %p745_p13  ;;  %p766_p0 = por %p765_p12, %p764_p1 }
  0x23   : > { %p760_p6 = pneg %p759_p10 }
  0x25   : > { %p767_p4 = pnand %p766_p0, %p760_p6 }
  0x27   : > { %770 = shalt.err (!%p767_p4)
}
  0x28   : > { %s919_s21 = smov 64   ;;  %s920_s22 = smov 4  }
  0x29   : > { %659 = dma.hbm_to_vmem [thread:$0]  (!%p1015_p11), %s1205_s1, 256, %s1008_s29, [#allocation7], %s919_s21, %s919_s21, %s920_s22  }
  0x2a   : > { %s771_s9 = scalar_lea.hbm %s1207_s3, 1024 }
  0x2b   : > { %p772_p1 = scmp.ne.s32.totalorder %s1207_s3, %s771_s9  ;;  %p778_p10 = scmp.lt.u32.totalorder %s771_s9, %s1207_s3 }
  0x2d   : > { %p774_p4 = pnand %p772_p1, %p745_p13 }
  0x2f   : > { %p775_p6 = pneg %p774_p4 }
  0x31   : > { %p780_p3 = pnand %p778_p10, %p775_p6 }
  0x33   : > { %783 = shalt.err (!%p780_p3)
}
  0x34   : > { %s784_s29 = scalar_lea.vmem %s1019_s6, 1024  ;;  %p792_p12 = scmp.lt.s32.totalorder %s1019_s6, %s1019_s6 }
  0x35   : > { %p785_p5 = scmp.ne.s32.totalorder %s1019_s6, %s784_s29  ;;  %p793_p0 = scmp.lt.s32.totalorder %s784_s29, %s784_s29 }
  0x37   : > { %p787_p7 = pnand %p785_p5, %p745_p13  ;;  %p794_p1 = por %p793_p0, %p792_p12 }
  0x39   : > { %p788_p9 = pneg %p787_p7 }
  0x3b   : > { %p795_p4 = pnand %p794_p1, %p788_p9 }
  0x3d   : > { %798 = shalt.err (!%p795_p4)
}
  0x3e   : > { %662 = dma.hbm_to_vmem [thread:$0]  (!%p1015_p11), %s1207_s3, 1024, %s1019_s6, [#allocation7], %s919_s21, %s919_s21, %s920_s22  }
  0x3f   : > { %s33_s5 = sadd.s32 1, %s911_s19  ;;  %s42_s7 = sadd.s32 1, %s903_s17 }
  0x40   : > { %p35_p13 = scmp.ge.s32.totalorder %s33_s5, 2  ;;  %p49_p6 = scmp.ne.s32.totalorder %s903_s17, %s899_s16 }
  0x41   : > { %p50_p10 = scmp.eq.s32.totalorder %s915_s20, 0  ;;  %p673_p3 = scmp.lt.s32.totalorder %s915_s20, 2 }
  0x42   : > { %s1232_s5 = smov (%p35_p13, %s33_s5), 0  ;;  %p1083_p7 = por %p988_p2, %p49_p6 }
  0x43   : > { %p51_p5 = por %p50_p10, %p49_p6  ;;  %s37_s8 = ssub.s32 %s911_s19, %s1232_s5 }
  0x44   : > { %s1219_s30 = scalar_select %p1083_p7, 1, 0 }
  0x45   : > { %s205_s9 = sand.u32 1, %s903_s17   ;;  %p40_p9 = scmp.eq.s32.totalorder %s37_s8, 0 }
  0x46   : > { %s581_s6 = sshll.u32 %s205_s9, 3  ;;  %s582_s21 = sshll.u32 %s911_s19, 7 }
  0x47   : > { %s1092_s22 = scalar_select %p40_p9, %s903_s17, %s42_s7  }
  0x48   : > { %s1097_s12 = scalar_lea.hbm %s1204_s0, %s582_s21  ;;  %s209_s24 = scalar_lea.vmem [#allocation3], %s581_s6 }
  0x49   : > { %s217_s13 = sshll.u32 %s209_s24, 4  ;;  %p1101_p2 = pnand %p673_p3, %p51_p5  ;;  %s1105_s13 = int_to_ptr.vmem [resolvable:$true] %s217_s13 }
  0x4a   : > { %s206_s14 = scalar_lea.sflag [#allocation4], %s205_s9  ;;  %s799_s28 = scalar_lea.hbm %s1097_s12, 128 }
  0x4b   : > { %p800_p11 = scmp.ne.s32.totalorder %s1097_s12, %s799_s28  ;;  %p801_p12 = pneg %p1101_p2 }
  0x4c   : > { %s804_s6 = scalar_lea.hbm %s1204_s0, 256  ;;  %p805_p4 = scmp.lt.u32.totalorder %s1097_s12, %s1204_s0 }
  0x4d   : > { %p802_p0 = pnand %p801_p12, %p800_p11  ;;  %p806_p13 = scmp.lt.u32.totalorder %s804_s6, %s799_s28 }
  0x4e   : > { %p808_p10 = scmp.lt.u32.totalorder %s799_s28, %s1097_s12 }
  0x4f   : > { %p803_p1 = pneg %p802_p0  ;;  %p807_p6 = por %p806_p13, %p805_p4 }
  0x51   : > { %p809_p3 = por %p808_p10, %p807_p6 }
  0x53   : > { %p810_p5 = pnand %p809_p3, %p803_p1 }
  0x55   : > { %813 = shalt.err (!%p810_p5)
}
  0x56   : > { %s814_s9 = scalar_lea.vmem %s1105_s13, 128  ;;  %s921_s11 = smov [#allocation3]  }
  0x57   : > { %p815_p9 = scmp.ne.s32.totalorder %s1105_s13, %s814_s9  ;;  %s819_s24 = sshll.u32 %s921_s11, 4  ;;  %s820_s24 = int_to_ptr.vmem [resolvable:$false] %s819_s24 }
  0x58   : > { %s821_s7 = scalar_lea.vmem %s820_s24, 256  ;;  %p822_p7 = scmp.lt.s32.totalorder %s1105_s13, %s820_s24 }
  0x59   : > { %p817_p11 = pnand %p815_p9, %p801_p12  ;;  %p823_p4 = scmp.lt.s32.totalorder %s821_s7, %s814_s9 }
  0x5b   : > { %p818_p0 = pneg %p817_p11  ;;  %p824_p13 = por %p823_p4, %p822_p7 }
  0x5d   : > { %p825_p6 = pnand %p824_p13, %p818_p0 }
  0x5f   : > { %828 = shalt.err (!%p825_p6)
}
  0x60   : > { %666 = dma.hbm_to_vmem [thread:$0]  (!%p1101_p2), %s1097_s12, 128, %s1105_s13, %s206_s14  }
  0x61   : > { %226 = sbr.rel (%p1004_p8) target bundleno = 579 (0x243), region = 36  ;;  %s1135_s28 = sand.u32 (!%p1004_p8), 1, %s899_s16  }
  0x62   : > { %s584_s8 = sshll.u32 (!%p1004_p8), %s1135_s28, 3  ;;  %s229_s6 = scalar_lea.sflag (!%p1004_p8), [#allocation4], %s1135_s28 }
  0x63   : > { %s232_s21 = scalar_lea.vmem (!%p1004_p8), [#allocation3], %s584_s8  ;;  %p1221_p7 = scmp.ne.s32.totalorder (!%p1004_p8), %s1215_s25, 0 }
  0x68   : > { %882 = dma.done.wait (%p1221_p7), %s229_s6, 128  }
  0x69   : > { %884 = vsyncadd (%p1221_p7), %s229_s6, 4294967168  ;;  %p1222_p12 = scmp.ne.s32.totalorder %s1213_s23, 0 }
  0x6b   : > { %886 = dma.done.wait (%p1222_p12), [#allocation7], 1280  }
  0x6c   : > { %888 = vsyncadd (%p1222_p12), [#allocation7], 4294966016  ;;  %v922_v0 = vmov 0.0   ;;  %vm923_vm0 = vmmov 0   ;;  %v731_v1 = vld [vmem:[#allocation6] sm:$0xff]   ;;  %v732_v2 = vld [vmem:[#allocation6 + $0x8] sm:$0xff]  }
  0x6d   : > { %616 = vmatprep.subr.bf16.mxu0 %v922_v0  ;;  %620 = vmatprep.mubr.msk.bf16.mxu0 %vm923_vm0, %v922_v0  ;;  %v273_v3 = vld [vmem:[%s232_s21] sm:$0xff]  ;;  %vm291_vm1 = vcmask 261120   ;;  %v735_v7 = vld [vmem:[#allocation8 + $0x10] sm:$0xff]   ;;  %v736_v8 = vld [vmem:[#allocation8 + $0x18] sm:$0xff]   ;;  %s587_s27 = sshll.u32 %s1135_s28, 2  ;;  %s601_s12 = sshll.u32 %s907_s18, 6 }
  0x6e   : > { %624 = vmatprep.subr.bf16.mxu1 %v922_v0  ;;  %640 = vmatprep.mubr.msk.bf16.mxu1 %vm923_vm0, %v922_v0  ;;  %v733_v4 = vld [vmem:[#allocation8] sm:$0xff]   ;;  %v274_v5 = vpack.c.bf16 %v273_v3, %v273_v3  ;;  %v734_v6 = vld [vmem:[#allocation8 + $0x8] sm:$0xff]   ;;  %v739_v11 = vld [vmem:[#allocation8 + $0x30] sm:$0xff]   ;;  %s264_s13 = scalar_lea.vmem [#allocation9], %s587_s27  ;;  %s1155_s9 = scalar_lea.hbm %s1208_s4, %s601_s12 }
  0x6f   : > { %617 = vmatpush3.bf16.msra.mxu0 %v731_v1  ;;  %625 = vmatpush3.bf16.msra.mxu1 %v733_v4  ;;  %v737_v9 = vld [vmem:[#allocation8 + $0x20] sm:$0xff]   ;;  %v738_v10 = vld [vmem:[#allocation8 + $0x28] sm:$0xff]   ;;  %v740_v12 = vld [vmem:[#allocation8 + $0x38] sm:$0xff]   ;;  %s475_s29 = sshll.u32 %s264_s13, 4  ;;  %s462_s11 = scalar_lea.sflag [#allocation5], %s1135_s28  ;;  %s1157_s29 = int_to_ptr.vmem [resolvable:$true] %s475_s29 }
  0x70   : > { %618 = vmatprep.subr.bf16.mxu0 %v922_v0  ;;  %626 = vmatprep.subr.bf16.mxu1 %v922_v0  ;;  %v591_v13 = vld [vmem:[%s1206_s2] ss:$0 sm:$0xff]  ;;  %s829_s18 = scalar_lea.vmem %s1157_s29, 64  ;;  %p1223_p2 = scmp.ne.s32.totalorder %s1219_s30, 0 }
  0x71   : > { %p830_p8 = scmp.ne.s32.totalorder %s1157_s29, %s829_s18  ;;  %s924_s24 = smov [#allocation9]  }
  0x72   : > { %s833_s7 = sshll.u32 %s924_s24, 4  ;;  %s834_s7 = int_to_ptr.vmem [resolvable:$false] %s833_s7 }
  0x73   : > { %619 = vmatpush3.bf16.msra.mxu0 %v732_v2  ;;  %627 = vmatpush3.bf16.msra.mxu1 %v734_v6  ;;  %p831_p1 = pnand %p830_p8, %p1223_p2  ;;  %s835_s8 = scalar_lea.vmem %s834_s7, 128 }
  0x74   : > { %628 = vmatprep.subr.bf16.mxu1 %v922_v0  ;;  %p836_p3 = scmp.lt.s32.totalorder %s1157_s29, %s834_s7  ;;  %p837_p5 = scmp.lt.s32.totalorder %s835_s8, %s829_s18 }
  0x75   : > { %p832_p10 = pneg %p831_p1 }
  0x76   : > { %621 = vmatmul.mubr.msk.bf16.vlgmr.msra.gmra.mrb[0].mxu0 %vm291_vm1, %v274_v5  ;;  %p838_p9 = por %p837_p5, %p836_p3 }
  0x77   : > { %629 = vmatpush3.bf16.msra.mxu1 %v735_v7 }
  0x78   : > { %630 = vmatprep.subr.bf16.mxu1 %v922_v0  ;;  %p839_p11 = pnand %p838_p9, %p832_p10 }
  0x7b   : > { %631 = vmatpush3.bf16.msra.mxu1 %v736_v8 }
  0x7c   : > { %632 = vmatprep.subr.bf16.mxu1 %v922_v0 }
  0x7f   : > { %633 = vmatpush3.bf16.msra.mxu1 %v737_v9 }
  0x80   : > { %634 = vmatprep.subr.bf16.mxu1 %v922_v0 }
  0x83   : > { %635 = vmatpush3.bf16.msra.mxu1 %v738_v10 }
  0x84   : > { %636 = vmatprep.subr.bf16.mxu1 %v922_v0 }
  0x87   : > { %637 = vmatpush3.bf16.msra.mxu1 %v739_v11 }
  0x88   : > { %638 = vmatprep.subr.bf16.mxu1 %v922_v0 }
  0x8b   : > { %639 = vmatpush3.bf16.msra.mxu1 %v740_v12 }
 0x149   : > { %v329_v14 = vpop.f32.mrb[0].mxu0 }
 0x14a   : > { %v348_v15 = vadd.f32 %v591_v13, %v329_v14  ;;  %v622_v16 = vpop.f32.mrb[1].mxu0 }
 0x14b   : > { %v332_v17 = vpop.f32.mrb[2].mxu0 }
 0x14c   : > { %v350_v18 = vmul.f32 0.70710677, %v348_v15  ;;  %v623_v19 = vpop.f32.mrb[3].mxu0  ;;  %v349_v21 = vmul.f32 0.5, %v348_v15 }
 0x14e   : > { %741 = verf.f32 %v350_v18 }
 0x158   : > { %v742_v20 = vpop.eup %741 }
 0x159   : > { %v352_v22 = vadd.f32 1.0, %v742_v20 }
 0x15b   : > { %v353_v23 = vmul.f32 %v352_v22, %v349_v21 }
 0x15d   : > { %v354_v24 = vpack.c.bf16 %v353_v23, %v353_v23 }
 0x15f   : > { %641 = vmatmul.mubr.bf16.vlgmr.msra.gmra.mrb[0].mxu1 %v354_v24 }
 0x232   : > { %v453_v25 = vpop.f32.mrb[0].mxu1 }
 0x233   : > { %v459_v26 = vpack.c.bf16 %v453_v25, %v453_v25  ;;  %v642_v27 = vpop.f32.mrb[1].mxu1 }
 0x234   : > { %v456_v28 = vpop.f32.mrb[2].mxu1 }
 0x235   : > { %460 = vst [vmem:[%s264_s13] sm:$0xf] %v459_v26  ;;  %v643_v29 = vpop.f32.mrb[3].mxu1 }
 0x236   : > { %842 = shalt.err (!%p839_p11)
}
 0x237   : > { %s843_s28 = scalar_lea.hbm %s1155_s9, 64  ;;  %s847_s23 = scalar_lea.hbm %s1208_s4, 128 }
 0x238   : > { %p844_p0 = scmp.ne.s32.totalorder %s1155_s9, %s843_s28  ;;  %p848_p6 = scmp.lt.u32.totalorder %s1155_s9, %s1208_s4 }
 0x239   : > { %p849_p7 = scmp.lt.u32.totalorder %s847_s23, %s843_s28  ;;  %p851_p8 = scmp.lt.u32.totalorder %s843_s28, %s1155_s9 }
 0x23a   : > { %p845_p4 = pnand %p844_p0, %p1223_p2 }
 0x23b   : > { %p850_p12 = por %p849_p7, %p848_p6 }
 0x23c   : > { %p846_p13 = pneg %p845_p4 }
 0x23d   : > { %p852_p1 = por %p851_p8, %p850_p12 }
 0x23f   : > { %p853_p10 = pnand %p852_p1, %p846_p13 }
 0x241   : > { %856 = shalt.err (!%p853_p10)
}
 0x242   : > { %654 = dma.vmem_to_hbm [thread:$0]  (%p1223_p2), %s1157_s29, 64, %s1155_s9, %s462_s11  }
 0x243 PF: > { %s487_s12 = sand.u32 1, %s895_s15   ;;  %p1224_p3 = scmp.ne.s32.totalorder %s1216_s26, 0 }
 0x244   : > { %p1225_p5 = scmp.ge.s32.totalorder %s915_s20, 2  ;;  %s488_s13 = scalar_lea.sflag [#allocation5], %s487_s12 }
 0x246   : > { %p668_p9 = pnand %p1225_p5, %p1224_p3 }
 0x248   : > { %890 = dma.done.wait (!%p668_p9), %s488_s13, 64  }
 0x249   : > { %892 = vsyncadd (!%p668_p9), %s488_s13, 4294967232  ;;  %s21_s20 = sadd.s32 1, %s915_s20   ;;  %s1226_s15 = smov %s899_s16 }
 0x24a   : > { %p18_p11 = scmp.ge.s32.totalorder %s21_s20, 4   ;;  %s1227_s16 = smov %s903_s17 }
 0x24b   : > { %s1228_s17 = smov %s1092_s22  ;;  %s1229_s18 = smov %s911_s19 }
 0x24c   : > { %s1230_s19 = smov %s1232_s5  ;;  %20 = sbr.rel (!%p18_p11) target bundleno = 7 (0x7), region = 98 }
 0x253   :  { %493 = vsyncpa [#allocation4], 1 }
 0x254   :  { %495 = vsyncpa [#allocation4 + $0x1], 1 }
 0x255   :  { %496 = vsyncpa [#allocation7], 1 }
 0x256   :  { %497 = vsyncpa [#allocation5], 1 }
 0x257   :  { %499 = vsyncpa [#allocation5 + $0x1], 1 }

</bundles_post_ra>
